<compile_context>
chip_gen: v7x
topology: tpu7x:2x2x1
jax: 0.10.0
libtpu: 0.0.40
codegen_flags: <defaults>
</compile_context>

<pallas_src>
import functools

import jax
import jax.numpy as jnp
from jax.experimental import pallas as pl
from jax.experimental.pallas import tpu as pltpu


def _copy_kernel(x_ref, o_ref):
    # Path A: the BlockSpec DMA already selected only the kept elements.
    # x_ref / o_ref: (B_t, out_res, out_res, C)
    o_ref[...] = x_ref[...]


def _col_slice_kernel(C, x_ref, o_ref):
    # Path B: rows already subsampled by the BlockSpec (squeezed row-phase dim).
    # x_ref: (B_t, out_res, out_res, stride*C); kept columns are the first C
    # lanes of every stride*C group (contiguous lane slice).
    o_ref[...] = x_ref[..., :C]


def _full_subsample_kernel(stride, x_ref, o_ref):
    # Path C: full image in VMEM, subsample both axes in-kernel.
    # x_ref: (B_t, res, res, C), o_ref: (B_t, out_res, out_res, C)
    x = x_ref[...]
    o_ref[...] = x[:, ::stride, ::stride, :]


def _pick_batch_tile(B, bytes_per_image, budget_bytes):
    """Largest divisor of B whose input block fits the budget; keep grid >= 2 if B >= 2."""
    bt = max(1, min(B, budget_bytes // max(1, bytes_per_image)))
    if B >= 2:
        bt = min(bt, B // 2)  # keep a >=2-wide parallel axis (v7x has 2 TCs)
    bt = max(1, bt)
    while B % bt:
        bt -= 1
    return bt


def subsample(x, stride, resolution, *, block_budget_bytes=1 << 21):
    """x: (B, N, C) with N == resolution**2. Returns (B, out_res**2, C)."""
    B, N, C = x.shape
    assert N == resolution * resolution, "N must equal resolution**2"
    out_res = (resolution + stride - 1) // stride  # matches python ::stride slicing
    itemsize = jnp.dtype(x.dtype).itemsize

    divisible = (resolution % stride) == 0
    fold_cols = divisible and (C % 128 == 0)

    # Per-image input-block size for the chosen path (drives the batch tile).
    if fold_cols:          # Path A: DMA reads exactly the kept elements.
        in_elems_per_img = out_res * out_res * C
    elif divisible:        # Path B: DMA drops skipped rows only.
        in_elems_per_img = out_res * out_res * stride * C
    else:                  # Path C: whole image.
        in_elems_per_img = resolution * resolution * C

    B_t = _pick_batch_tile(B, in_elems_per_img * itemsize, block_budget_bytes)
    grid = (B // B_t,)

    if divisible:
        # (B, res, res, C) -> (B, out_res, stride, out_res, stride*C); the kept
        # elements are [:, :, 0, :, 0:C].  The reshape is contiguous (free).
        operand = x.reshape(B, out_res, stride, out_res, stride * C)
        if fold_cols:
            in_spec = pl.BlockSpec(
                (B_t, out_res, None, out_res, C),           # None squeezes the row-phase dim
                lambda b: (b, 0, 0, 0, 0))
            kernel = _copy_kernel
        else:
            in_spec = pl.BlockSpec(
                (B_t, out_res, None, out_res, stride * C),  # rows folded, cols sliced in-kernel
                lambda b: (b, 0, 0, 0, 0))
            kernel = functools.partial(_col_slice_kernel, C)
    else:
        operand = x.reshape(B, resolution, resolution, C)
        in_spec = pl.BlockSpec(
            (B_t, resolution, resolution, C),
            lambda b: (b, 0, 0, 0))
        kernel = functools.partial(_full_subsample_kernel, stride)

    out4 = pl.pallas_call(
        kernel,
        out_shape=jax.ShapeDtypeStruct((B, out_res, out_res, C), x.dtype),
        grid_spec=pltpu.PrefetchScalarGridSpec(
            num_scalar_prefetch=0,
            grid=grid,
            in_specs=[in_spec],
            out_specs=pl.BlockSpec((B_t, out_res, out_res, C),
                                   lambda b: (b, 0, 0, 0)),
        ),
        compiler_params=pltpu.CompilerParams(
            dimension_semantics=("parallel",),
            vmem_limit_bytes=32 << 20,
        ),
    )(operand)

    return out4.reshape(B, out_res * out_res, C)


def _reference(x, stride, resolution):
    B, N, C = x.shape
    x4 = x.reshape(B, resolution, resolution, C)
    return x4[:, ::stride, ::stride, :].reshape(B, -1, C)


if __name__ == "__main__":
    key = jax.random.PRNGKey(0)
    cases = [
        # (B, resolution, C, stride)
        (2, 16, 128, 2),   # Path A: row + column subsample folded into the DMA
        (2, 16, 32, 2),    # Path B: rows folded into the DMA, columns sliced in-kernel
        (2, 16, 64, 4),    # Path B with stride 4
        (1, 14, 64, 2),    # Path B, B=1, odd out_res (=7)
        (2, 7, 32, 2),     # Path C: non-divisible resolution (out_res = ceil(7/2) = 4)
    ]
    for i, (B, resolution, C, stride) in enumerate(cases):
        N = resolution * resolution
        k = jax.random.fold_in(key, i)
        x = jax.random.normal(k, (B, N, C), dtype=jnp.float32)

        out = jax.block_until_ready(subsample(x, stride, resolution))
        ref = _reference(x, stride, resolution)

        assert out.shape == ref.shape, (out.shape, ref.shape)
        assert jnp.allclose(out, ref), f"mismatch vs reference in case {i}"

    print("KERNEL_OK")
</pallas_src>

<mosaic_0001>
module attributes {stable_mosaic.version = 11 : i64} {
  func.func @_copy_kernel(%arg0: i32, %arg1: memref<1x8x1x8x128xf32, #tpu.memory_space<vmem>>, %arg2: memref<1x8x8x128xf32, #tpu.memory_space<vmem>>) attributes {dimension_semantics = [#tpu.dimension_semantics<parallel>], iteration_bounds = array<i64: 2>, scalar_prefetch = 0 : i64, scratch_operands = 0 : i64, tpu.core_type = #tpu.core_type<tc>, window_params = [{transform_indices = @transform_0, window_bounds = array<i64: 1, 8, 1, 8, 128>}, {transform_indices = @transform_1, window_bounds = array<i64: 1, 8, 8, 128>}]} {
    %c0 = arith.constant 0 : index
    %c0_0 = arith.constant 0 : index
    %c0_1 = arith.constant 0 : index
    %c0_2 = arith.constant 0 : index
    %c0_3 = arith.constant 0 : index
    %0 = vector.load %arg1[%c0, %c0_0, %c0_1, %c0_2, %c0_3] : memref<1x8x1x8x128xf32, #tpu.memory_space<vmem>>, vector<1x8x1x8x128xf32>
    %1 = vector.shape_cast %0 : vector<1x8x1x8x128xf32> to vector<1x8x8x128xf32>
    %c0_4 = arith.constant 0 : index
    %c0_5 = arith.constant 0 : index
    %c0_6 = arith.constant 0 : index
    %c0_7 = arith.constant 0 : index
    %2 = vector.load %arg2[%c0_4, %c0_5, %c0_6, %c0_7] : memref<1x8x8x128xf32, #tpu.memory_space<vmem>>, vector<1x8x8x128xf32>
    tpu.vector_store %arg2[%c0_4, %c0_5, %c0_6, %c0_7], %1 {strides = array<i32>} : memref<1x8x8x128xf32, #tpu.memory_space<vmem>>, vector<1x8x8x128xf32>,
    return
  }
  func.func @transform_0(%arg0: i32) -> (i32, i32, i32, i32, i32) {
    %c0_i32 = arith.constant 0 : i32
    %c0_i32_0 = arith.constant 0 : i32
    %c0_i32_1 = arith.constant 0 : i32
    %c0_i32_2 = arith.constant 0 : i32
    %c0_i32_3 = arith.constant 0 : i32
    return %arg0, %c0_i32, %c0_i32_0, %c0_i32_1, %c0_i32_2 : i32, i32, i32, i32, i32
  }
  func.func @transform_1(%arg0: i32) -> (i32, i32, i32, i32) {
    %c0_i32 = arith.constant 0 : i32
    %c0_i32_0 = arith.constant 0 : i32
    %c0_i32_1 = arith.constant 0 : i32
    %c0_i32_2 = arith.constant 0 : i32
    return %arg0, %c0_i32, %c0_i32_0, %c0_i32_1 : i32, i32, i32, i32
  }
}

</mosaic_0001>

<bundles_post_ra>
// kernel: tpu_custom_call.1
= control target key start
LH: loop header
LB: loop body
LE: loop exit
PB: predicated region body
PF: predicated region fallthrough
CT: control target
= control target key end

     0   :  { %6 = vsyncpa [#allocation3], 0  ;;  %s584_s0 = inlined_call_operand.hbm [shape: f32[2,8,2,8,256], index: 0, kind: input, shape index: {}]   ;;  %s585_s1 = inlined_call_operand.hbm [shape: f32[2,8,8,128], index: 1, kind: output, shape index: {}]  }
   0x1   :  { %8 = vsyncpa [#allocation3 + $0x1], 0 }
   0x2   :  { %9 = vsyncpa [#allocation4], 0 }
   0x3   :  { %11 = vsyncpa [#allocation4 + $0x1], 0  ;;  %s420_s6 = smov 0   ;;  %s422_s7 = smov 0  }
   0x4   :  { %s424_s8 = smov 0   ;;  %s426_s9 = smov 0  }
   0x5 LB: > { %s441_s10 = sadd.s32 4294967295, %s401_s9   ;;  %s238_s11 = sadd.s32 4294967294, %s401_s9   ;;  %s401_s9 = sphi %s426_s9, %s599_s9   ;;  %s397_s8 = sphi %s424_s8, %s598_s8   ;;  %s393_s7 = sphi %s422_s7, %s597_s7   ;;  %s389_s6 = sphi %s420_s6, %s596_s6  }
   0x6   : > { %s445_s12 = sadd.s32 1, %s401_s9   ;;  %s24_s13 = sadd.s32 1, %s397_s8 }
   0x7   : > { %s21_s14 = ssub.s32 %s401_s9, %s445_s12  ;;  %p31_p0 = scmp.ne.s32.totalorder %s397_s8, %s393_s7 }
   0x8   : > { %p22_p1 = scmp.eq.s32.totalorder %s21_s14, 0  ;;  %p32_p2 = scmp.eq.s32.totalorder %s401_s9, 0 }
   0x9   : > { %p37_p3 = scmp.ne.s32.totalorder %s393_s7, %s389_s6  ;;  %p38_p4 = scmp.eq.s32.totalorder %s441_s10, 0 }
   0xa   : > { %s457_s15 = scalar_select %p22_p1, %s397_s8, %s24_s13  }
   0xb   : > { %p459_p5 = por %p32_p2, %p31_p0  ;;  %p463_p6 = por %p38_p4, %p37_p3 }
   0xc   : > { %p61_p7 = scmp.eq.s32.totalorder %s441_s10, 1  ;;  %p67_p8 = scmp.eq.s32.totalorder %s238_s11, 1 }
   0xd   : > { %p266_p10 = scmp.lt.s32.totalorder %s401_s9, 2  ;;  %s87_s20 = sand.u32 1, %s397_s8  }
   0xe   : > { %p470_p11 = por %p61_p7, %p31_p0  ;;  %p474_p12 = por %p67_p8, %p37_p3 }
   0xf   : > { %s252_s21 = sshll.u32 %s401_s9, 12  ;;  %s241_s22 = sshll.u32 %s87_s20, 6 }
  0x10   : > { %s589_s18 = scalar_select %p470_p11, 1, 0 }
  0x11   : > { %s590_s19 = scalar_select %p474_p12, 1, 0 }
  0x12   : > { %s483_s25 = scalar_lea.hbm %s584_s0, %s252_s21  ;;  %s91_s26 = scalar_lea.vmem [#allocation2], %s241_s22 }
  0x13   : > { %s98_s27 = sshll.u32 %s91_s26, 4  ;;  %p487_p13 = pnand %p266_p10, %p459_p5  ;;  %s491_s27 = int_to_ptr.vmem [resolvable:$true] %s98_s27 }
  0x14   : > { %s494_s29 = scalar_lea.sflag [#allocation3], %s87_s20  ;;  %s305_s30 = scalar_lea.hbm %s483_s25, 1024 }
  0x15   : > { %p306_p1 = scmp.ne.s32.totalorder %s483_s25, %s305_s30  ;;  %p307_p2 = pneg %p487_p13 }
  0x16   : > { %s310_s4 = scalar_lea.hbm %s584_s0, 8192  ;;  %p311_p5 = scmp.lt.u32.totalorder %s483_s25, %s584_s0 }
  0x17   : > { %p308_p3 = pnand %p307_p2, %p306_p1  ;;  %p312_p7 = scmp.lt.u32.totalorder %s310_s4, %s305_s30 }
  0x18   : > { %p314_p10 = scmp.lt.u32.totalorder %s305_s30, %s483_s25 }
  0x19   : > { %p309_p4 = pneg %p308_p3  ;;  %p313_p8 = por %p312_p7, %p311_p5 }
  0x1b   : > { %p315_p9 = por %p314_p10, %p313_p8 }
  0x1d   : > { %p316_p0 = pnand %p315_p9, %p309_p4 }
  0x1f   : > { %319 = shalt.err (!%p316_p0)
}
  0x20   : > { %s320_s13 = scalar_lea.vmem %s491_s27, 1024  ;;  %s403_s14 = smov [#allocation2]  }
  0x21   : > { %p321_p1 = scmp.ne.s32.totalorder %s491_s27, %s320_s13  ;;  %s325_s16 = sshll.u32 %s403_s14, 4  ;;  %s326_s16 = int_to_ptr.vmem [resolvable:$false] %s325_s16 }
  0x22   : > { %s327_s20 = scalar_lea.vmem %s326_s16, 2048  ;;  %p328_p11 = scmp.lt.s32.totalorder %s491_s27, %s326_s16 }
  0x23   : > { %p323_p3 = pnand %p321_p1, %p307_p2  ;;  %p329_p5 = scmp.lt.s32.totalorder %s327_s20, %s320_s13 }
  0x25   : > { %p324_p12 = pneg %p323_p3  ;;  %p330_p7 = por %p329_p5, %p328_p11 }
  0x27   : > { %p331_p8 = pnand %p330_p7, %p324_p12 }
  0x29   : > { %334 = shalt.err (!%p331_p8)
}
  0x2a   : > { %s404_s21 = smov 512   ;;  %s405_s22 = smov 128  }
  0x2b   : > { %s406_s23 = smov 8   ;;  %p106_p9 = scmp.lt.s32.totalorder %s401_s9, 3 }
  0x2c   : > { %261 = dma.hbm_to_vmem [thread:$0]  (!%p487_p13), %s483_s25, 1024, %s491_s27, %s494_s29, %s404_s21, %s405_s22, %s406_s23  }
  0x2d   : > { %p592_p0 = scmp.ge.s32.totalorder %s401_s9, 1 }
  0x2f   : > { %p107_p2 = pnand %p592_p0, %p106_p9 }
  0x30   : > { %s526_s24 = sand.u32 (!%p107_p2), 1, %s393_s7  }
  0x31   : > { %110 = sbr.rel (%p107_p2) target bundleno = 84 (0x54), region = 24  ;;  %s245_s26 = sshll.u32 (!%p107_p2), %s526_s24, 6 }
  0x32   : > { %s113_s30 = scalar_lea.sflag (!%p107_p2), [#allocation3], %s526_s24  ;;  %s116_s2 = scalar_lea.vmem (!%p107_p2), [#allocation2], %s245_s26 }
  0x38   : > { %380 = dma.done.wait (%p463_p6), %s113_s30, 1024  }
  0x39   : > { %382 = vsyncadd (%p463_p6), %s113_s30, 4294966272  ;;  %s134_s25 = scalar_lea.vmem [#allocation5], %s245_s26  ;;  %s253_s28 = sshll.u32 %s441_s10, 10  ;;  %v135_v0 = vld [vmem:[%s116_s2] sm:$0xff]  ;;  %v136_v1 = vld [vmem:[%s116_s2 + $0x8] sm:$0xff] }
  0x3a   : > { %s165_s27 = sshll.u32 %s134_s25, 4  ;;  %v137_v2 = vld [vmem:[%s116_s2 + $0x10] sm:$0xff]  ;;  %s540_s4 = scalar_lea.hbm %s585_s1, %s253_s28  ;;  %143 = vst [vmem:[%s134_s25] sm:$0xff] %v135_v0  ;;  %144 = vst [vmem:[%s134_s25 + $0x8] sm:$0xff] %v136_v1  ;;  %v138_v3 = vld [vmem:[%s116_s2 + $0x18] sm:$0xff]  ;;  %s535_s27 = int_to_ptr.vmem [resolvable:$true] %s165_s27 }
  0x3b   : > { %145 = vst [vmem:[%s134_s25 + $0x10] sm:$0xff] %v137_v2  ;;  %v139_v4 = vld [vmem:[%s116_s2 + $0x20] sm:$0xff]  ;;  %v140_v5 = vld [vmem:[%s116_s2 + $0x28] sm:$0xff]  ;;  %146 = vst [vmem:[%s134_s25 + $0x18] sm:$0xff] %v138_v3  ;;  %s152_s10 = scalar_lea.sflag [#allocation4], %s526_s24  ;;  %s335_s17 = scalar_lea.vmem %s535_s27, 1024 }
  0x3c   : > { %147 = vst [vmem:[%s134_s25 + $0x20] sm:$0xff] %v139_v4  ;;  %148 = vst [vmem:[%s134_s25 + $0x28] sm:$0xff] %v140_v5  ;;  %v141_v6 = vld [vmem:[%s116_s2 + $0x30] sm:$0xff]  ;;  %v142_v7 = vld [vmem:[%s116_s2 + $0x38] sm:$0xff]  ;;  %p336_p6 = scmp.ne.s32.totalorder %s535_s27, %s335_s17  ;;  %p593_p11 = scmp.ne.s32.totalorder %s589_s18, 0 }
  0x3d   : > { %149 = vst [vmem:[%s134_s25 + $0x30] sm:$0xff] %v141_v6  ;;  %150 = vst [vmem:[%s134_s25 + $0x38] sm:$0xff] %v142_v7  ;;  %s407_s5 = smov [#allocation5]  }
  0x3e   : > { %p337_p12 = pnand %p336_p6, %p593_p11  ;;  %s339_s11 = sshll.u32 %s407_s5, 4  ;;  %s340_s11 = int_to_ptr.vmem [resolvable:$false] %s339_s11 }
  0x3f   : > { %s341_s13 = scalar_lea.vmem %s340_s11, 2048  ;;  %p342_p4 = scmp.lt.s32.totalorder %s535_s27, %s340_s11 }
  0x40   : > { %p338_p13 = pneg %p337_p12  ;;  %p343_p10 = scmp.lt.s32.totalorder %s341_s13, %s335_s17 }
  0x42   : > { %p344_p1 = por %p343_p10, %p342_p4 }
  0x44   : > { %p345_p3 = pnand %p344_p1, %p338_p13 }
  0x46   : > { %348 = shalt.err (!%p345_p3)
}
  0x47   : > { %s349_s14 = scalar_lea.hbm %s540_s4, 1024  ;;  %s353_s21 = scalar_lea.hbm %s585_s1, 2048 }
  0x48   : > { %p350_p5 = scmp.ne.s32.totalorder %s540_s4, %s349_s14  ;;  %p354_p9 = scmp.lt.u32.totalorder %s540_s4, %s585_s1 }
  0x49   : > { %p355_p0 = scmp.lt.u32.totalorder %s353_s21, %s349_s14  ;;  %p357_p6 = scmp.lt.u32.totalorder %s349_s14, %s540_s4 }
  0x4a   : > { %p351_p7 = pnand %p350_p5, %p593_p11 }
  0x4b   : > { %p356_p2 = por %p355_p0, %p354_p9 }
  0x4c   : > { %p352_p8 = pneg %p351_p7 }
  0x4d   : > { %p358_p12 = por %p357_p6, %p356_p2 }
  0x4f   : > { %p359_p13 = pnand %p358_p12, %p352_p8 }
  0x51   : > { %362 = shalt.err (!%p359_p13)
}
  0x52   : > { %s408_s26 = smov 128   ;;  %s409_s30 = smov 8  }
  0x53   : > { %256 = dma.vmem_to_hbm [thread:$0]  (%p593_p11), %s535_s27, 1024, %s540_s4, %s152_s10, %s408_s26, %s408_s26, %s409_s30  }
  0x54 PF: > { %s180_s2 = sand.u32 1, %s389_s6   ;;  %p594_p4 = scmp.ne.s32.totalorder %s590_s19, 0 }
  0x55   : > { %p595_p10 = scmp.ge.s32.totalorder %s401_s9, 2  ;;  %s181_s25 = scalar_lea.sflag [#allocation4], %s180_s2 }
  0x57   : > { %p263_p1 = pnand %p595_p10, %p594_p4 }
  0x59   : > { %384 = dma.done.wait (!%p263_p1), %s181_s25, 1024  }
  0x5a   : > { %386 = vsyncadd (!%p263_p1), %s181_s25, 4294966272  ;;  %p14_p3 = scmp.ge.s32.totalorder %s445_s12, 4   ;;  %s596_s6 = smov %s393_s7 }
  0x5b   : > { %s597_s7 = smov %s397_s8  ;;  %s598_s8 = smov %s457_s15 }
  0x5c   : > { %s599_s9 = smov %s445_s12  ;;  %16 = sbr.rel (!%p14_p3) target bundleno = 5 (0x5), region = 69 }
  0x63   :  { %186 = vsyncpa [#allocation3], 1 }
  0x64   :  { %188 = vsyncpa [#allocation3 + $0x1], 1 }
  0x65   :  { %189 = vsyncpa [#allocation4], 1 }
  0x66   :  { %191 = vsyncpa [#allocation4 + $0x1], 1 }

</bundles_post_ra>
